<compile_context>
chip_gen: v7x
topology: tpu7x:2x2x1
jax: 0.10.0
libtpu: 0.0.40
codegen_flags: <defaults>
</compile_context>

<pallas_src>
import functools

import jax
import jax.numpy as jnp
import numpy as np
from jax import lax
from jax.experimental import pallas as pl
from jax.experimental.pallas import tpu as pltpu

_LANE = 128
_SUBLANE = 8


def _round_up(n, m):
    return ((n + m - 1) // m) * m


# ---------------------------------------------------------------------------
# Fused kernel: grid over time CHUNKS.
#   prologue : bulk input projection for the chunk (MXU)      -> xp_scratch
#   body     : serial recurrence, h carried in VMEM scratch   -> hstates_ref
#   epilogue : bulk output projection for the chunk (MXU)     -> out_ref
# ---------------------------------------------------------------------------
def _rnn_fused_kernel(x_ref, wih_ref, whh_ref, wout_ref, brnn_ref, bout_ref,
                      out_ref, hstates_ref, h_scratch, xp_scratch, *, unroll):
    c = pl.program_id(0)

    @pl.when(c == 0)
    def _():
        h_scratch[...] = jnp.zeros_like(h_scratch)

    t_chunk, b_pad, i_pad = x_ref.shape
    h_pad = whh_ref.shape[0]
    o_pad = wout_ref.shape[1]

    # ---- Fused input projection for the whole chunk (one bulk MXU matmul) --
    x_chunk = x_ref[...].reshape(t_chunk * b_pad, i_pad)
    xp = jnp.dot(x_chunk, wih_ref[...],
                 preferred_element_type=jnp.float32) + brnn_ref[...]
    xp_scratch[...] = xp.reshape(t_chunk, b_pad, h_pad)

    whhT = whh_ref[...]  # (H_pad, H_pad), resident across all chunks

    # ---- Serial recurrence: the only latency chain left ---------------------
    def step(t, h):
        pre = xp_scratch[t] + jnp.dot(h, whhT,
                                      preferred_element_type=jnp.float32)
        h_new = jnp.tanh(pre)                      # (B_pad, H_pad) f32
        hstates_ref[t] = h_new.astype(hstates_ref.dtype)
        return h_new

    h_final = lax.fori_loop(0, t_chunk, step, h_scratch[...], unroll=unroll)
    h_scratch[...] = h_final

    # ---- Fused output projection for the whole chunk ------------------------
    h_chunk = hstates_ref[...].astype(jnp.float32).reshape(t_chunk * b_pad, h_pad)
    out = jnp.dot(h_chunk, wout_ref[...],
                  preferred_element_type=jnp.float32) + bout_ref[...]
    out_ref[...] = out.reshape(t_chunk, b_pad, o_pad).astype(out_ref.dtype)


def _pick_time_chunk(S, max_chunk=64):
    # Fixed-size chunk; S is padded up to a multiple (no divisor hunting, so a
    # prime S no longer degrades to t_chunk=1).
    return max(1, min(max_chunk, S))


def rnn_net_forward(x, w_ih, w_hh, b_ih, b_hh, w_out, b_out,
                    *, max_time_chunk=64, unroll=8):
    """x: [S, B, I] -> (outputs [S, B, O], rnn_states [S, B, H])."""
    S, B, I = x.shape
    H = w_ih.shape[0]
    O = w_out.shape[0]
    out_dtype = x.dtype
    f32 = jnp.float32

    # Lane/sublane-dense padded sizes.
    B_pad = _round_up(B, _SUBLANE)
    I_pad = _round_up(I, _LANE)
    H_pad = _round_up(H, _LANE)
    O_pad = _round_up(O, _LANE)

    t_chunk = _pick_time_chunk(S, max_time_chunk)
    S_pad = _round_up(S, t_chunk)
    n_chunks = S_pad // t_chunk

    # Pre-transpose + zero-pad weights once; fold the two RNN biases.
    w_ihT = jnp.zeros((I_pad, H_pad), f32).at[:I, :H].set(jnp.asarray(w_ih, f32).T)
    w_hhT = jnp.zeros((H_pad, H_pad), f32).at[:H, :H].set(jnp.asarray(w_hh, f32).T)
    w_outT = jnp.zeros((H_pad, O_pad), f32).at[:H, :O].set(jnp.asarray(w_out, f32).T)
    b_rnn = jnp.zeros((1, H_pad), f32).at[0, :H].set(
        jnp.asarray(b_ih, f32) + jnp.asarray(b_hh, f32))
    b_o = jnp.zeros((1, O_pad), f32).at[0, :O].set(jnp.asarray(b_out, f32))

    # Zero-padded input (padded batch rows / lanes / timesteps stay inert).
    x_pad = jnp.zeros((S_pad, B_pad, I_pad), f32).at[:S, :B, :I].set(
        jnp.asarray(x, f32))

    kernel = functools.partial(_rnn_fused_kernel, unroll=unroll)

    grid_spec = pltpu.PrefetchScalarGridSpec(
        num_scalar_prefetch=0,
        grid=(n_chunks,),
        in_specs=[
            pl.BlockSpec((t_chunk, B_pad, I_pad), lambda c: (c, 0, 0)),  # x chunk
            pl.BlockSpec((I_pad, H_pad), lambda c: (0, 0)),              # W_ih^T
            pl.BlockSpec((H_pad, H_pad), lambda c: (0, 0)),              # W_hh^T
            pl.BlockSpec((H_pad, O_pad), lambda c: (0, 0)),              # W_out^T
            pl.BlockSpec((1, H_pad), lambda c: (0, 0)),                  # b_ih+b_hh
            pl.BlockSpec((1, O_pad), lambda c: (0, 0)),                  # b_out
        ],
        out_specs=[
            pl.BlockSpec((t_chunk, B_pad, O_pad), lambda c: (c, 0, 0)),  # outputs
            pl.BlockSpec((t_chunk, B_pad, H_pad), lambda c: (c, 0, 0)),  # hstates
        ],
        scratch_shapes=[
            pltpu.VMEM((B_pad, H_pad), jnp.float32),            # carried h
            pltpu.VMEM((t_chunk, B_pad, H_pad), jnp.float32),   # chunk Xp
        ],
    )

    outputs_pad, hstates_pad = pl.pallas_call(
        kernel,
        out_shape=(
            jax.ShapeDtypeStruct((S_pad, B_pad, O_pad), out_dtype),
            jax.ShapeDtypeStruct((S_pad, B_pad, H_pad), out_dtype),
        ),
        grid_spec=grid_spec,
        compiler_params=pltpu.CompilerParams(
            dimension_semantics=("arbitrary",),   # time chunks are sequential
        ),
    )(x_pad, w_ihT, w_hhT, w_outT, b_rnn, b_o)

    # Strip padding (padded lanes/rows/timesteps carry no real data).
    return outputs_pad[:S, :B, :O], hstates_pad[:S, :B, :H]


def rnn_net_reference(x, w_ih, w_hh, b_ih, b_hh, w_out, b_out):
    """Plain-JAX reference for correctness checking (full-precision matmuls)."""
    S, B, _ = x.shape
    H = w_ih.shape[0]
    hp = jax.lax.Precision.HIGHEST
    h = jnp.zeros((B, H), jnp.float32)
    outs, hs = [], []
    for t in range(S):
        h = jnp.tanh(jnp.dot(x[t], w_ih.T, precision=hp) + b_ih
                     + jnp.dot(h, w_hh.T, precision=hp) + b_hh)
        hs.append(h)
        outs.append(jnp.dot(h, w_out.T, precision=hp) + b_out)
    return jnp.stack(outs, 0), jnp.stack(hs, 0)


if __name__ == "__main__":
    # Small, deterministic example shapes consistent with the module.
    S, B = 8, 2            # sequence length, batch
    I, H, O = 16, 32, 4    # input_size, hidden_size, output_size

    key = jax.random.PRNGKey(0)
    ks = jax.random.split(key, 7)
    bound = 1.0 / np.sqrt(H)  # PyTorch-style uniform init bound

    x = jax.random.normal(ks[0], (S, B, I), jnp.float32)
    w_ih = jax.random.uniform(ks[1], (H, I), jnp.float32, -bound, bound)
    w_hh = jax.random.uniform(ks[2], (H, H), jnp.float32, -bound, bound)
    b_ih = jax.random.uniform(ks[3], (H,), jnp.float32, -bound, bound)
    b_hh = jax.random.uniform(ks[4], (H,), jnp.float32, -bound, bound)
    w_out = jax.random.uniform(ks[5], (O, H), jnp.float32, -bound, bound)
    b_out = jax.random.uniform(ks[6], (O,), jnp.float32, -bound, bound)

    outputs, rnn_states = rnn_net_forward(x, w_ih, w_hh, b_ih, b_hh, w_out, b_out)
    jax.block_until_ready((outputs, rnn_states))

    ref_out, ref_h = rnn_net_reference(x, w_ih, w_hh, b_ih, b_hh, w_out, b_out)
    np.testing.assert_allclose(np.asarray(outputs), np.asarray(ref_out),
                               rtol=1e-4, atol=1e-5)
    np.testing.assert_allclose(np.asarray(rnn_states), np.asarray(ref_h),
                               rtol=1e-4, atol=1e-5)

    print("KERNEL_OK")
</pallas_src>

<mosaic_0001>
module attributes {stable_mosaic.version = 11 : i64} {
  func.func @_rnn_fused_kernel(%arg0: i32, %arg1: memref<8x8x128xf32, #tpu.memory_space<vmem>>, %arg2: memref<128x128xf32, #tpu.memory_space<vmem>>, %arg3: memref<128x128xf32, #tpu.memory_space<vmem>>, %arg4: memref<128x128xf32, #tpu.memory_space<vmem>>, %arg5: memref<1x128xf32, #tpu.memory_space<vmem>>, %arg6: memref<1x128xf32, #tpu.memory_space<vmem>>, %arg7: memref<8x8x128xf32, #tpu.memory_space<vmem>>, %arg8: memref<8x8x128xf32, #tpu.memory_space<vmem>>, %arg9: memref<8x128xf32, #tpu.memory_space<vmem>>, %arg10: memref<8x8x128xf32, #tpu.memory_space<vmem>>) attributes {dimension_semantics = [#tpu.dimension_semantics<arbitrary>], iteration_bounds = array<i64: 1>, scalar_prefetch = 0 : i64, scratch_operands = 2 : i64, tpu.core_type = #tpu.core_type<tc>, window_params = [{transform_indices = @transform_0, window_bounds = array<i64: 8, 8, 128>}, {pipeline_mode = #tpu.pipeline_mode<synchronous>, transform_indices = @transform_1, window_bounds = array<i64: 128, 128>}, {pipeline_mode = #tpu.pipeline_mode<synchronous>, transform_indices = @transform_2, window_bounds = array<i64: 128, 128>}, {pipeline_mode = #tpu.pipeline_mode<synchronous>, transform_indices = @transform_3, window_bounds = array<i64: 128, 128>}, {pipeline_mode = #tpu.pipeline_mode<synchronous>, transform_indices = @transform_4, window_bounds = array<i64: 1, 128>}, {pipeline_mode = #tpu.pipeline_mode<synchronous>, transform_indices = @transform_5, window_bounds = array<i64: 1, 128>}, {transform_indices = @transform_6, window_bounds = array<i64: 8, 8, 128>}, {transform_indices = @transform_7, window_bounds = array<i64: 8, 8, 128>}]} {
    %c0_i32 = arith.constant 0 : i32
    %0 = arith.cmpi eq, %arg0, %c0_i32 : i32
    %1 = arith.extui %0 : i1 to i32
    %c0_i32_0 = arith.constant 0 : i32
    %2 = arith.cmpi ne, %1, %c0_i32_0 : i32
    scf.if %2 {
      %cst_68 = arith.constant 0.000000e+00 : f32
      %104 = vector.broadcast %cst_68 : f32 to vector<8x128xf32>
      %c0_69 = arith.constant 0 : index
      %c0_70 = arith.constant 0 : index
      %105 = vector.load %arg9[%c0_69, %c0_70] : memref<8x128xf32, #tpu.memory_space<vmem>>, vector<8x128xf32>
      tpu.vector_store %arg9[%c0_69, %c0_70], %104 {strides = array<i32>} : memref<8x128xf32, #tpu.memory_space<vmem>>, vector<8x128xf32>,
    } else {
    }
    %c0 = arith.constant 0 : index
    %c0_1 = arith.constant 0 : index
    %c0_2 = arith.constant 0 : index
    %3 = vector.load %arg1[%c0, %c0_1, %c0_2] : memref<8x8x128xf32, #tpu.memory_space<vmem>>, vector<8x8x128xf32>
    %4 = vector.shape_cast %3 : vector<8x8x128xf32> to vector<64x128xf32>
    %c0_3 = arith.constant 0 : index
    %c0_4 = arith.constant 0 : index
    %5 = vector.load %arg2[%c0_3, %c0_4] : memref<128x128xf32, #tpu.memory_space<vmem>>, vector<128x128xf32>
    %cst = arith.constant dense<0.000000e+00> : vector<64x128xf32>
    %6 = tpu.matmul %4, %5, %cst {dimension_numbers = #tpu.dot_dimension_numbers<[1], [0], [0], [1], [0, 0, 1, 1], [], []>} : vector<64x128xf32>, vector<128x128xf32>, vector<64x128xf32> -> vector<64x128xf32>
    %c0_5 = arith.constant 0 : index
    %c0_6 = arith.constant 0 : index
    %7 = vector.load %arg5[%c0_5, %c0_6] : memref<1x128xf32, #tpu.memory_space<vmem>>, vector<1x128xf32>
    %8 = vector.broadcast %7 : vector<1x128xf32> to vector<64x128xf32>
    %9 = arith.addf %6, %8 : vector<64x128xf32>
    %10 = vector.shape_cast %9 : vector<64x128xf32> to vector<8x8x128xf32>
    %c0_7 = arith.constant 0 : index
    %c0_8 = arith.constant 0 : index
    %c0_9 = arith.constant 0 : index
    %11 = vector.load %arg10[%c0_7, %c0_8, %c0_9] : memref<8x8x128xf32, #tpu.memory_space<vmem>>, vector<8x8x128xf32>
    tpu.vector_store %arg10[%c0_7, %c0_8, %c0_9], %10 {strides = array<i32>} : memref<8x8x128xf32, #tpu.memory_space<vmem>>, vector<8x8x128xf32>,
    %c0_10 = arith.constant 0 : index
    %c0_11 = arith.constant 0 : index
    %12 = vector.load %arg3[%c0_10, %c0_11] : memref<128x128xf32, #tpu.memory_space<vmem>>, vector<128x128xf32>
    %c0_12 = arith.constant 0 : index
    %c0_13 = arith.constant 0 : index
    %13 = vector.load %arg9[%c0_12, %c0_13] : memref<8x128xf32, #tpu.memory_space<vmem>>, vector<8x128xf32>
    %c0_i32_14 = arith.constant 0 : i32
    %14 = arith.index_cast %c0_i32_14 : i32 to index
    %c0_15 = arith.constant 0 : index
    %c0_16 = arith.constant 0 : index
    %15 = vector.load %arg10[%14, %c0_15, %c0_16] : memref<8x8x128xf32, #tpu.memory_space<vmem>>, vector<1x8x128xf32>
    %16 = vector.shape_cast %15 : vector<1x8x128xf32> to vector<8x128xf32>
    %cst_17 = arith.constant dense<0.000000e+00> : vector<8x128xf32>
    %17 = tpu.matmul %13, %12, %cst_17 {dimension_numbers = #tpu.dot_dimension_numbers<[1], [0], [0], [1], [0, 0, 1, 1], [], []>} : vector<8x128xf32>, vector<128x128xf32>, vector<8x128xf32> -> vector<8x128xf32>
    %18 = arith.addf %16, %17 : vector<8x128xf32>
    %19 = math.tanh %18 : vector<8x128xf32>
    %20 = arith.index_cast %c0_i32_14 : i32 to index
    %c0_18 = arith.constant 0 : index
    %c0_19 = arith.constant 0 : index
    %21 = vector.load %arg8[%20, %c0_18, %c0_19] : memref<8x8x128xf32, #tpu.memory_space<vmem>>, vector<1x8x128xf32>
    %22 = vector.shape_cast %21 : vector<1x8x128xf32> to vector<8x128xf32>
    %23 = vector.shape_cast %19 : vector<8x128xf32> to vector<1x8x128xf32>
    tpu.vector_store %arg8[%20, %c0_18, %c0_19], %23 {strides = array<i32>} : memref<8x8x128xf32, #tpu.memory_space<vmem>>, vector<1x8x128xf32>,
    %c1_i32 = arith.constant 1 : i32
    %24 = arith.index_cast %c1_i32 : i32 to index
    %c0_20 = arith.constant 0 : index
    %c0_21 = arith.constant 0 : index
    %25 = vector.load %arg10[%24, %c0_20, %c0_21] : memref<8x8x128xf32, #tpu.memory_space<vmem>>, vector<1x8x128xf32>
    %26 = vector.shape_cast %25 : vector<1x8x128xf32> to vector<8x128xf32>
    %cst_22 = arith.constant dense<0.000000e+00> : vector<8x128xf32>
    %27 = tpu.matmul %19, %12, %cst_22 {dimension_numbers = #tpu.dot_dimension_numbers<[1], [0], [0], [1], [0, 0, 1, 1], [], []>} : vector<8x128xf32>, vector<128x128xf32>, vector<8x128xf32> -> vector<8x128xf32>
    %28 = arith.addf %26, %27 : vector<8x128xf32>
    %29 = math.tanh %28 : vector<8x128xf32>
    %30 = arith.index_cast %c1_i32 : i32 to index
    %c0_23 = arith.constant 0 : index
    %c0_24 = arith.constant 0 : index
    %31 = vector.load %arg8[%30, %c0_23, %c0_24] : memref<8x8x128xf32, #tpu.memory_space<vmem>>, vector<1x8x128xf32>
    %32 = vector.shape_cast %31 : vector<1x8x128xf32> to vector<8x128xf32>
    %33 = vector.shape_cast %29 : vector<8x128xf32> to vector<1x8x128xf32>
    tpu.vector_store %arg8[%30, %c0_23, %c0_24], %33 {strides = array<i32>} : memref<8x8x128xf32, #tpu.memory_space<vmem>>, vector<1x8x128xf32>,
    %c2_i32 = arith.constant 2 : i32
    %34 = arith.index_cast %c2_i32 : i32 to index
    %c0_25 = arith.constant 0 : index
    %c0_26 = arith.constant 0 : index
    %35 = vector.load %arg10[%34, %c0_25, %c0_26] : memref<8x8x128xf32, #tpu.memory_space<vmem>>, vector<1x8x128xf32>
    %36 = vector.shape_cast %35 : vector<1x8x128xf32> to vector<8x128xf32>
    %cst_27 = arith.constant dense<0.000000e+00> : vector<8x128xf32>
    %37 = tpu.matmul %29, %12, %cst_27 {dimension_numbers = #tpu.dot_dimension_numbers<[1], [0], [0], [1], [0, 0, 1, 1], [], []>} : vector<8x128xf32>, vector<128x128xf32>, vector<8x128xf32> -> vector<8x128xf32>
    %38 = arith.addf %36, %37 : vector<8x128xf32>
    %39 = math.tanh %38 : vector<8x128xf32>
    %40 = arith.index_cast %c2_i32 : i32 to index
    %c0_28 = arith.constant 0 : index
    %c0_29 = arith.constant 0 : index
    %41 = vector.load %arg8[%40, %c0_28, %c0_29] : memref<8x8x128xf32, #tpu.memory_space<vmem>>, vector<1x8x128xf32>
    %42 = vector.shape_cast %41 : vector<1x8x128xf32> to vector<8x128xf32>
    %43 = vector.shape_cast %39 : vector<8x128xf32> to vector<1x8x128xf32>
    tpu.vector_store %arg8[%40, %c0_28, %c0_29], %43 {strides = array<i32>} : memref<8x8x128xf32, #tpu.memory_space<vmem>>, vector<1x8x128xf32>,
    %c3_i32 = arith.constant 3 : i32
    %44 = arith.index_cast %c3_i32 : i32 to index
    %c0_30 = arith.constant 0 : index
    %c0_31 = arith.constant 0 : index
    %45 = vector.load %arg10[%44, %c0_30, %c0_31] : memref<8x8x128xf32, #tpu.memory_space<vmem>>, vector<1x8x128xf32>
    %46 = vector.shape_cast %45 : vector<1x8x128xf32> to vector<8x128xf32>
    %cst_32 = arith.constant dense<0.000000e+00> : vector<8x128xf32>
    %47 = tpu.matmul %39, %12, %cst_32 {dimension_numbers = #tpu.dot_dimension_numbers<[1], [0], [0], [1], [0, 0, 1, 1], [], []>} : vector<8x128xf32>, vector<128x128xf32>, vector<8x128xf32> -> vector<8x128xf32>
    %48 = arith.addf %46, %47 : vector<8x128xf32>
    %49 = math.tanh %48 : vector<8x128xf32>
    %50 = arith.index_cast %c3_i32 : i32 to index
    %c0_33 = arith.constant 0 : index
    %c0_34 = arith.constant 0 : index
    %51 = vector.load %arg8[%50, %c0_33, %c0_34] : memref<8x8x128xf32, #tpu.memory_space<vmem>>, vector<1x8x128xf32>
    %52 = vector.shape_cast %51 : vector<1x8x128xf32> to vector<8x128xf32>
    %53 = vector.shape_cast %49 : vector<8x128xf32> to vector<1x8x128xf32>
    tpu.vector_store %arg8[%50, %c0_33, %c0_34], %53 {strides = array<i32>} : memref<8x8x128xf32, #tpu.memory_space<vmem>>, vector<1x8x128xf32>,
    %c4_i32 = arith.constant 4 : i32
    %54 = arith.index_cast %c4_i32 : i32 to index
    %c0_35 = arith.constant 0 : index
    %c0_36 = arith.constant 0 : index
    %55 = vector.load %arg10[%54, %c0_35, %c0_36] : memref<8x8x128xf32, #tpu.memory_space<vmem>>, vector<1x8x128xf32>
    %56 = vector.shape_cast %55 : vector<1x8x128xf32> to vector<8x128xf32>
    %cst_37 = arith.constant dense<0.000000e+00> : vector<8x128xf32>
    %57 = tpu.matmul %49, %12, %cst_37 {dimension_numbers = #tpu.dot_dimension_numbers<[1], [0], [0], [1], [0, 0, 1, 1], [], []>} : vector<8x128xf32>, vector<128x128xf32>, vector<8x128xf32> -> vector<8x128xf32>
    %58 = arith.addf %56, %57 : vector<8x128xf32>
    %59 = math.tanh %58 : vector<8x128xf32>
    %60 = arith.index_cast %c4_i32 : i32 to index
    %c0_38 = arith.constant 0 : index
    %c0_39 = arith.constant 0 : index
    %61 = vector.load %arg8[%60, %c0_38, %c0_39] : memref<8x8x128xf32, #tpu.memory_space<vmem>>, vector<1x8x128xf32>
    %62 = vector.shape_cast %61 : vector<1x8x128xf32> to vector<8x128xf32>
    %63 = vector.shape_cast %59 : vector<8x128xf32> to vector<1x8x128xf32>
    tpu.vector_store %arg8[%60, %c0_38, %c0_39], %63 {strides = array<i32>} : memref<8x8x128xf32, #tpu.memory_space<vmem>>, vector<1x8x128xf32>,
    %c5_i32 = arith.constant 5 : i32
    %64 = arith.index_cast %c5_i32 : i32 to index
    %c0_40 = arith.constant 0 : index
    %c0_41 = arith.constant 0 : index
    %65 = vector.load %arg10[%64, %c0_40, %c0_41] : memref<8x8x128xf32, #tpu.memory_space<vmem>>, vector<1x8x128xf32>
    %66 = vector.shape_cast %65 : vector<1x8x128xf32> to vector<8x128xf32>
    %cst_42 = arith.constant dense<0.000000e+00> : vector<8x128xf32>
    %67 = tpu.matmul %59, %12, %cst_42 {dimension_numbers = #tpu.dot_dimension_numbers<[1], [0], [0], [1], [0, 0, 1, 1], [], []>} : vector<8x128xf32>, vector<128x128xf32>, vector<8x128xf32> -> vector<8x128xf32>
    %68 = arith.addf %66, %67 : vector<8x128xf32>
    %69 = math.tanh %68 : vector<8x128xf32>
    %70 = arith.index_cast %c5_i32 : i32 to index
    %c0_43 = arith.constant 0 : index
    %c0_44 = arith.constant 0 : index
    %71 = vector.load %arg8[%70, %c0_43, %c0_44] : memref<8x8x128xf32, #tpu.memory_space<vmem>>, vector<1x8x128xf32>
    %72 = vector.shape_cast %71 : vector<1x8x128xf32> to vector<8x128xf32>
    %73 = vector.shape_cast %69 : vector<8x128xf32> to vector<1x8x128xf32>
    tpu.vector_store %arg8[%70, %c0_43, %c0_44], %73 {strides = array<i32>} : memref<8x8x128xf32, #tpu.memory_space<vmem>>, vector<1x8x128xf32>,
    %c6_i32 = arith.constant 6 : i32
    %74 = arith.index_cast %c6_i32 : i32 to index
    %c0_45 = arith.constant 0 : index
    %c0_46 = arith.constant 0 : index
    %75 = vector.load %arg10[%74, %c0_45, %c0_46] : memref<8x8x128xf32, #tpu.memory_space<vmem>>, vector<1x8x128xf32>
    %76 = vector.shape_cast %75 : vector<1x8x128xf32> to vector<8x128xf32>
    %cst_47 = arith.constant dense<0.000000e+00> : vector<8x128xf32>
    %77 = tpu.matmul %69, %12, %cst_47 {dimension_numbers = #tpu.dot_dimension_numbers<[1], [0], [0], [1], [0, 0, 1, 1], [], []>} : vector<8x128xf32>, vector<128x128xf32>, vector<8x128xf32> -> vector<8x128xf32>
    %78 = arith.addf %76, %77 : vector<8x128xf32>
    %79 = math.tanh %78 : vector<8x128xf32>
    %80 = arith.index_cast %c6_i32 : i32 to index
    %c0_48 = arith.constant 0 : index
    %c0_49 = arith.constant 0 : index
    %81 = vector.load %arg8[%80, %c0_48, %c0_49] : memref<8x8x128xf32, #tpu.memory_space<vmem>>, vector<1x8x128xf32>
    %82 = vector.shape_cast %81 : vector<1x8x128xf32> to vector<8x128xf32>
    %83 = vector.shape_cast %79 : vector<8x128xf32> to vector<1x8x128xf32>
    tpu.vector_store %arg8[%80, %c0_48, %c0_49], %83 {strides = array<i32>} : memref<8x8x128xf32, #tpu.memory_space<vmem>>, vector<1x8x128xf32>,
    %c7_i32 = arith.constant 7 : i32
    %84 = arith.index_cast %c7_i32 : i32 to index
    %c0_50 = arith.constant 0 : index
    %c0_51 = arith.constant 0 : index
    %85 = vector.load %arg10[%84, %c0_50, %c0_51] : memref<8x8x128xf32, #tpu.memory_space<vmem>>, vector<1x8x128xf32>
    %86 = vector.shape_cast %85 : vector<1x8x128xf32> to vector<8x128xf32>
    %cst_52 = arith.constant dense<0.000000e+00> : vector<8x128xf32>
    %87 = tpu.matmul %79, %12, %cst_52 {dimension_numbers = #tpu.dot_dimension_numbers<[1], [0], [0], [1], [0, 0, 1, 1], [], []>} : vector<8x128xf32>, vector<128x128xf32>, vector<8x128xf32> -> vector<8x128xf32>
    %88 = arith.addf %86, %87 : vector<8x128xf32>
    %89 = math.tanh %88 : vector<8x128xf32>
    %90 = arith.index_cast %c7_i32 : i32 to index
    %c0_53 = arith.constant 0 : index
    %c0_54 = arith.constant 0 : index
    %91 = vector.load %arg8[%90, %c0_53, %c0_54] : memref<8x8x128xf32, #tpu.memory_space<vmem>>, vector<1x8x128xf32>
    %92 = vector.shape_cast %91 : vector<1x8x128xf32> to vector<8x128xf32>
    %93 = vector.shape_cast %89 : vector<8x128xf32> to vector<1x8x128xf32>
    tpu.vector_store %arg8[%90, %c0_53, %c0_54], %93 {strides = array<i32>} : memref<8x8x128xf32, #tpu.memory_space<vmem>>, vector<1x8x128xf32>,
    %c8_i32 = arith.constant 8 : i32
    %c0_55 = arith.constant 0 : index
    %c0_56 = arith.constant 0 : index
    %94 = vector.load %arg9[%c0_55, %c0_56] : memref<8x128xf32, #tpu.memory_space<vmem>>, vector<8x128xf32>
    tpu.vector_store %arg9[%c0_55, %c0_56], %89 {strides = array<i32>} : memref<8x128xf32, #tpu.memory_space<vmem>>, vector<8x128xf32>,
    %c0_57 = arith.constant 0 : index
    %c0_58 = arith.constant 0 : index
    %c0_59 = arith.constant 0 : index
    %95 = vector.load %arg8[%c0_57, %c0_58, %c0_59] : memref<8x8x128xf32, #tpu.memory_space<vmem>>, vector<8x8x128xf32>
    %96 = vector.shape_cast %95 : vector<8x8x128xf32> to vector<64x128xf32>
    %c0_60 = arith.constant 0 : index
    %c0_61 = arith.constant 0 : index
    %97 = vector.load %arg4[%c0_60, %c0_61] : memref<128x128xf32, #tpu.memory_space<vmem>>, vector<128x128xf32>
    %cst_62 = arith.constant dense<0.000000e+00> : vector<64x128xf32>
    %98 = tpu.matmul %96, %97, %cst_62 {dimension_numbers = #tpu.dot_dimension_numbers<[1], [0], [0], [1], [0, 0, 1, 1], [], []>} : vector<64x128xf32>, vector<128x128xf32>, vector<64x128xf32> -> vector<64x128xf32>
    %c0_63 = arith.constant 0 : index
    %c0_64 = arith.constant 0 : index
    %99 = vector.load %arg6[%c0_63, %c0_64] : memref<1x128xf32, #tpu.memory_space<vmem>>, vector<1x128xf32>
    %100 = vector.broadcast %99 : vector<1x128xf32> to vector<64x128xf32>
    %101 = arith.addf %98, %100 : vector<64x128xf32>
    %102 = vector.shape_cast %101 : vector<64x128xf32> to vector<8x8x128xf32>
    %c0_65 = arith.constant 0 : index
    %c0_66 = arith.constant 0 : index
    %c0_67 = arith.constant 0 : index
    %103 = vector.load %arg7[%c0_65, %c0_66, %c0_67] : memref<8x8x128xf32, #tpu.memory_space<vmem>>, vector<8x8x128xf32>
    tpu.vector_store %arg7[%c0_65, %c0_66, %c0_67], %102 {strides = array<i32>} : memref<8x8x128xf32, #tpu.memory_space<vmem>>, vector<8x8x128xf32>,
    return
  }
  func.func @transform_0(%arg0: i32) -> (i32, i32, i32) {
    %c0_i32 = arith.constant 0 : i32
    %c0_i32_0 = arith.constant 0 : i32
    %c0_i32_1 = arith.constant 0 : i32
    return %arg0, %c0_i32, %c0_i32_0 : i32, i32, i32
  }
  func.func @transform_1(%arg0: i32) -> (i32, i32) {
    %c0_i32 = arith.constant 0 : i32
    %c0_i32_0 = arith.constant 0 : i32
    %c0_i32_1 = arith.constant 0 : i32
    return %c0_i32, %c0_i32_0 : i32, i32
  }
  func.func @transform_2(%arg0: i32) -> (i32, i32) {
    %c0_i32 = arith.constant 0 : i32
    %c0_i32_0 = arith.constant 0 : i32
    %c0_i32_1 = arith.constant 0 : i32
    return %c0_i32, %c0_i32_0 : i32, i32
  }
  func.func @transform_3(%arg0: i32) -> (i32, i32) {
    %c0_i32 = arith.constant 0 : i32
    %c0_i32_0 = arith.constant 0 : i32
    %c0_i32_1 = arith.constant 0 : i32
    return %c0_i32, %c0_i32_0 : i32, i32
  }
  func.func @transform_4(%arg0: i32) -> (i32, i32) {
    %c0_i32 = arith.constant 0 : i32
    %c0_i32_0 = arith.constant 0 : i32
    %c0_i32_1 = arith.constant 0 : i32
    return %c0_i32, %c0_i32_0 : i32, i32
  }
  func.func @transform_5(%arg0: i32) -> (i32, i32) {
    %c0_i32 = arith.constant 0 : i32
    %c0_i32_0 = arith.constant 0 : i32
    %c0_i32_1 = arith.constant 0 : i32
    return %c0_i32, %c0_i32_0 : i32, i32
  }
  func.func @transform_6(%arg0: i32) -> (i32, i32, i32) {
    %c0_i32 = arith.constant 0 : i32
    %c0_i32_0 = arith.constant 0 : i32
    %c0_i32_1 = arith.constant 0 : i32
    return %arg0, %c0_i32, %c0_i32_0 : i32, i32, i32
  }
  func.func @transform_7(%arg0: i32) -> (i32, i32, i32) {
    %c0_i32 = arith.constant 0 : i32
    %c0_i32_0 = arith.constant 0 : i32
    %c0_i32_1 = arith.constant 0 : i32
    return %arg0, %c0_i32, %c0_i32_0 : i32, i32, i32
  }
}

</mosaic_0001>

<bundles_post_ra>
// kernel: tpu_custom_call.1
= control target key start
LH: loop header
LB: loop body
LE: loop exit
PB: predicated region body
PF: predicated region fallthrough
CT: control target
= control target key end

     0   :  { %13 = vsyncpa [#allocation5], 0  ;;  %s2382_s0 = inlined_call_operand.hbm [shape: f32[8,8,128], index: 0, kind: input, shape index: {}]   ;;  %s2383_s1 = inlined_call_operand.hbm [shape: f32[128,128], index: 1, kind: input, shape index: {}]   ;;  %s2384_s2 = inlined_call_operand.hbm [shape: f32[128,128], index: 2, kind: input, shape index: {}]   ;;  %s2385_s3 = inlined_call_operand.hbm [shape: f32[128,128], index: 3, kind: input, shape index: {}]   ;;  %s2386_s4 = inlined_call_operand.vmem [shape: f32[1,128], index: 4, kind: input, shape index: {}]   ;;  %s2387_s5 = inlined_call_operand.vmem [shape: f32[1,128], index: 5, kind: input, shape index: {}]   ;;  %s2388_s6 = inlined_call_operand.hbm [shape: f32[8,8,128], index: 6, kind: output, shape index: {0}]   ;;  %s2389_s7 = inlined_call_operand.hbm [shape: f32[8,8,128], index: 7, kind: output, shape index: {1}]  }
   0x1   :  { %14 = vsyncpa [#allocation8], 0 }
   0x2   :  { %15 = vsyncpa [#allocation11], 0 }
   0x3   :  { %16 = vsyncpa [#allocation6], 0 }
   0x4   :  { %17 = vsyncpa [#allocation14], 0  ;;  %s2013_s24 = smov [#allocation7]   ;;  %s2014_s26 = smov [#allocation4]  }
   0x5   :  { %s35_s25 = sshll.u32 %s2013_s24, 4  ;;  %s23_s27 = sshll.u32 %s2014_s26, 4  ;;  %s36_s25 = int_to_ptr.vmem [resolvable:$true] %s35_s25  ;;  %s2064_s27 = int_to_ptr.vmem [resolvable:$true] %s23_s27 }
   0x6   :  { %s1871_s30 = scalar_lea.hbm %s2383_s1, 2048 }
   0x7   :  { %p1872_p0 = scmp.ne.s32.totalorder %s2383_s1, %s1871_s30  ;;  %p1875_p1 = scmp.lt.u32.totalorder %s1871_s30, %s2383_s1 }
   0x9   :  { %p1877_p2 = pnand %p1875_p1, %p1872_p0 }
   0xb   :  { %1880 = shalt.err (!%p1877_p2)
}
   0xc   :  { %s1881_s12 = scalar_lea.vmem %s36_s25, 2048  ;;  %p1886_p4 = scmp.lt.s32.totalorder %s36_s25, %s36_s25 }
   0xd   :  { %p1882_p3 = scmp.ne.s32.totalorder %s36_s25, %s1881_s12  ;;  %p1887_p5 = scmp.lt.s32.totalorder %s1881_s12, %s1881_s12 }
   0xf   :  { %p1888_p6 = por %p1887_p5, %p1886_p4 }
  0x11   :  { %p1889_p7 = pnand %p1888_p6, %p1882_p3 }
  0x13   :  { %1892 = shalt.err (!%p1889_p7)
}
  0x14   :  { %s2015_s13 = smov 128   ;;  %s2016_s14 = smov 8  }
  0x15   :  { %41 = dma.hbm_to_vmem [thread:$0]  %s2383_s1, 2048, %s36_s25, [#allocation8], %s2015_s13, %s2015_s13, %s2016_s14  }
  0x16   :  { %s1893_s19 = scalar_lea.hbm %s2382_s0, 1024 }
  0x17   :  { %p1894_p8 = scmp.ne.s32.totalorder %s2382_s0, %s1893_s19  ;;  %p1897_p9 = scmp.lt.u32.totalorder %s1893_s19, %s2382_s0 }
  0x19   :  { %p1899_p10 = pnand %p1897_p9, %p1894_p8 }
  0x1b   :  { %1902 = shalt.err (!%p1899_p10)
}
  0x1c   :  { %s1903_s24 = scalar_lea.vmem %s2064_s27, 1024  ;;  %p1908_p12 = scmp.lt.s32.totalorder %s2064_s27, %s2064_s27 }
  0x1d   :  { %p1904_p11 = scmp.ne.s32.totalorder %s2064_s27, %s1903_s24  ;;  %p1909_p13 = scmp.lt.s32.totalorder %s1903_s24, %s1903_s24 }
  0x1f   :  { %p1910_p0 = por %p1909_p13, %p1908_p12 }
  0x21   :  { %p1911_p1 = pnand %p1910_p0, %p1904_p11 }
  0x23   :  { %1914 = shalt.err (!%p1911_p1)
}
  0x24   :  { %29 = dma.hbm_to_vmem [thread:$0]  %s2382_s0, 1024, %s2064_s27, [#allocation5], %s2015_s13, %s2015_s13, %s2016_s14  }
  0x25   :  { %s2017_s26 = smov [#allocation9]   ;;  %s2018_s29 = smov [#allocation10]  }
  0x26   :  { %s47_s28 = sshll.u32 %s2017_s26, 4  ;;  %s59_s30 = sshll.u32 %s2018_s29, 4  ;;  %s48_s28 = int_to_ptr.vmem [resolvable:$true] %s47_s28  ;;  %s2101_s30 = int_to_ptr.vmem [resolvable:$true] %s59_s30 }
  0x27   :  { %s1915_s10 = scalar_lea.hbm %s2384_s2, 2048 }
  0x28   :  { %p1916_p2 = scmp.ne.s32.totalorder %s2384_s2, %s1915_s10  ;;  %p1919_p3 = scmp.lt.u32.totalorder %s1915_s10, %s2384_s2 }
  0x2a   :  { %p1921_p4 = pnand %p1919_p3, %p1916_p2 }
  0x2c   :  { %1924 = shalt.err (!%p1921_p4)
}
  0x2d   :  { %s1925_s0 = scalar_lea.vmem %s48_s28, 2048  ;;  %p1930_p6 = scmp.lt.s32.totalorder %s48_s28, %s48_s28 }
  0x2e   :  { %p1926_p5 = scmp.ne.s32.totalorder %s48_s28, %s1925_s0  ;;  %p1931_p7 = scmp.lt.s32.totalorder %s1925_s0, %s1925_s0 }
  0x30   :  { %p1932_p8 = por %p1931_p7, %p1930_p6 }
  0x32   :  { %p1933_p9 = pnand %p1932_p8, %p1926_p5 }
  0x34   :  { %1936 = shalt.err (!%p1933_p9)
}
  0x35   :  { %53 = dma.hbm_to_vmem [thread:$0]  %s2384_s2, 2048, %s48_s28, [#allocation8], %s2015_s13, %s2015_s13, %s2016_s14  }
  0x36   :  { %s1937_s20 = scalar_lea.hbm %s2385_s3, 2048 }
  0x37   :  { %p1938_p10 = scmp.ne.s32.totalorder %s2385_s3, %s1937_s20  ;;  %p1941_p11 = scmp.lt.u32.totalorder %s1937_s20, %s2385_s3 }
  0x39   :  { %p1943_p12 = pnand %p1941_p11, %p1938_p10 }
  0x3b   :  { %1946 = shalt.err (!%p1943_p12)
}
  0x3c   :  { %s1947_s1 = scalar_lea.vmem %s2101_s30, 2048  ;;  %p1952_p0 = scmp.lt.s32.totalorder %s2101_s30, %s2101_s30 }
  0x3d   :  { %p1948_p13 = scmp.ne.s32.totalorder %s2101_s30, %s1947_s1  ;;  %p1953_p1 = scmp.lt.s32.totalorder %s1947_s1, %s1947_s1 }
  0x3f   :  { %p1954_p2 = por %p1953_p1, %p1952_p0 }
  0x41   :  { %p1955_p3 = pnand %p1954_p2, %p1948_p13 }
  0x43   :  { %1958 = shalt.err (!%p1955_p3)
}
  0x44   :  { %65 = dma.hbm_to_vmem [thread:$0]  %s2385_s3, 2048, %s2101_s30, [#allocation11], %s2015_s13, %s2015_s13, %s2016_s14  }
  0x45   :  { %2003 = dma.done.wait [#allocation5], 1024  }
  0x46   :  { %2004 = vsyncadd [#allocation5], 4294966272 }
  0x47   :  { %2005 = dma.done.wait [#allocation8], 4096  }
  0x48   :  { %2006 = vsyncadd [#allocation8], 4294963200 }
  0x49   :  { %2007 = dma.done.wait [#allocation11], 2048  }
  0x4a   :  { %2008 = vsyncadd [#allocation11], 4294965248  ;;  %v2019_v0 = vmov 0.0|0.0   ;;  %vm2020_vm0 = vmmov 0   ;;  %v2021_v1 = vmov 0.0   ;;  %v95_v2 = vld [vmem:[#allocation7] sm:$0xff] }
  0x4b   :  { %1620 = vmatprep.subr.bf16.mxu1 %v2019_v0  ;;  %1296 = vmatprep.mubr.msk.f32.mxu1 %vm2020_vm0, %v2021_v1  ;;  %v96_v3 = vld [vmem:[#allocation7 + $0x8] sm:$0xff]  ;;  %v231_v4 = vld [vmem:[#allocation9] sm:$0xff]  ;;  %v97_v7 = vld [vmem:[#allocation7 + $0x10] sm:$0xff] }
  0x4c   :  { %v1588_v5 = vpack.c.bf16 %v96_v3, %v95_v2  ;;  %v232_v6 = vld [vmem:[#allocation9 + $0x8] sm:$0xff]  ;;  %v98_v8 = vld [vmem:[#allocation7 + $0x18] sm:$0xff]  ;;  %v233_v11 = vld [vmem:[#allocation9 + $0x10] sm:$0xff] }
  0x4d   :  { %v2141_v9 = vpack.c.bf16 %v232_v6, %v231_v4  ;;  %v1592_v10 = vpack.c.bf16 %v98_v8, %v97_v7  ;;  %v234_v12 = vld [vmem:[#allocation9 + $0x18] sm:$0xff]  ;;  %v99_v13 = vld [vmem:[#allocation7 + $0x20] sm:$0xff]  ;;  %v100_v14 = vld [vmem:[#allocation7 + $0x28] sm:$0xff] }
  0x4e   :  { %1589 = vmatprep.subr.bf16.mxu0 %v1588_v5  ;;  %v2144_v15 = vpack.c.bf16 %v234_v12, %v233_v11  ;;  %v1596_v16 = vpack.c.bf16 %v100_v14, %v99_v13  ;;  %v235_v17 = vld [vmem:[#allocation9 + $0x20] sm:$0xff]  ;;  %v236_v18 = vld [vmem:[#allocation9 + $0x28] sm:$0xff]  ;;  %v101_v19 = vld [vmem:[#allocation7 + $0x30] sm:$0xff] }
  0x4f   :  { %1591 = vmatpush3.bf16.msra.mxu0 %v1588_v5  ;;  %1622 = vmatpush3.bf16.msra.mxu1 %v2141_v9  ;;  %v102_v20 = vld [vmem:[#allocation7 + $0x38] sm:$0xff]  ;;  %v2148_v21 = vpack.c.bf16 %v236_v18, %v235_v17  ;;  %v237_v23 = vld [vmem:[#allocation9 + $0x30] sm:$0xff]  ;;  %v103_v25 = vld [vmem:[#allocation7 + $0x40] sm:$0xff] }
  0x50   :  { %1593 = vmatprep.subr.bf16.mxu0 %v1592_v10  ;;  %1623 = vmatprep.subr.bf16.mxu1 %v2019_v0  ;;  %v1600_v22 = vpack.c.bf16 %v102_v20, %v101_v19  ;;  %v238_v24 = vld [vmem:[#allocation9 + $0x38] sm:$0xff]  ;;  %v104_v26 = vld [vmem:[#allocation7 + $0x48] sm:$0xff]  ;;  %v87_v27 = vld [vmem:[#allocation4] sm:$0xff] }
  0x51   :  { %1252 = vmatprep.mubr.f32.mxu0 %v87_v27  ;;  %v2152_v28 = vpack.c.bf16 %v238_v24, %v237_v23  ;;  %v1604_v29 = vpack.c.bf16 %v104_v26, %v103_v25  ;;  %v239_v30 = vld [vmem:[#allocation9 + $0x40] sm:$0xff]  ;;  %v240_v31 = vld [vmem:[#allocation9 + $0x48] sm:$0xff]  ;;  %v105_v32 = vld [vmem:[#allocation7 + $0x50] sm:$0xff] }
  0x52   :  { %v106_v33 = vld [vmem:[#allocation7 + $0x58] sm:$0xff]  ;;  %v2156_v34 = vpack.c.bf16 %v240_v31, %v239_v30  ;;  %v241_v36 = vld [vmem:[#allocation9 + $0x50] sm:$0xff]  ;;  %v107_v38 = vld [vmem:[#allocation7 + $0x60] sm:$0xff] }
  0x53   :  { %1595 = vmatpush3.bf16.msra.mxu0 %v1592_v10  ;;  %1625 = vmatpush3.bf16.msra.mxu1 %v2144_v15  ;;  %v1608_v35 = vpack.c.bf16 %v106_v33, %v105_v32  ;;  %v242_v37 = vld [vmem:[#allocation9 + $0x58] sm:$0xff]  ;;  %v108_v39 = vld [vmem:[#allocation7 + $0x68] sm:$0xff]  ;;  %v243_v42 = vld [vmem:[#allocation9 + $0x60] sm:$0xff] }
  0x54   :  { %1597 = vmatprep.subr.bf16.mxu0 %v1596_v16  ;;  %1626 = vmatprep.subr.bf16.mxu1 %v2019_v0  ;;  %v2160_v40 = vpack.c.bf16 %v242_v37, %v241_v36  ;;  %v1612_v41 = vpack.c.bf16 %v108_v39, %v107_v38  ;;  %v244_v43 = vld [vmem:[#allocation9 + $0x68] sm:$0xff]  ;;  %v109_v44 = vld [vmem:[#allocation7 + $0x70] sm:$0xff]  ;;  %v110_v45 = vld [vmem:[#allocation7 + $0x78] sm:$0xff] }
  0x55   :  { %v2164_v46 = vpack.c.bf16 %v244_v43, %v243_v42  ;;  %v1616_v47 = vpack.c.bf16 %v110_v45, %v109_v44  ;;  %v245_v48 = vld [vmem:[#allocation9 + $0x70] sm:$0xff]  ;;  %v246_v49 = vld [vmem:[#allocation9 + $0x78] sm:$0xff]  ;;  %v88_v51 = vld [vmem:[#allocation4 + $0x8] sm:$0xff] }
  0x56   :  { %v2168_v50 = vpack.c.bf16 %v246_v49, %v245_v48  ;;  %v89_v52 = vld [vmem:[#allocation4 + $0x10] sm:$0xff]  ;;  %v90_v53 = vld [vmem:[#allocation4 + $0x18] sm:$0xff]  ;;  %v91_v54 = vld [vmem:[#allocation4 + $0x20] sm:$0xff] }
  0x57   :  { %1599 = vmatpush3.bf16.msra.mxu0 %v1596_v16  ;;  %1628 = vmatpush3.bf16.msra.mxu1 %v2148_v21  ;;  %v92_v55 = vld [vmem:[#allocation4 + $0x28] sm:$0xff]  ;;  %v93_v56 = vld [vmem:[#allocation4 + $0x30] sm:$0xff]  ;;  %v94_v57 = vld [vmem:[#allocation4 + $0x38] sm:$0xff] }
  0x58   :  { %1601 = vmatprep.subr.bf16.mxu0 %v1600_v22  ;;  %1629 = vmatprep.subr.bf16.mxu1 %v2019_v0  ;;  %v2214_v58 = vld [vmem:[%s2386_s4] ss:$0 sm:$0xff]  ;;  %v865_v36 = vld [vmem:[#allocation10 + $0x10] sm:$0xff]  ;;  %v866_v37 = vld [vmem:[#allocation10 + $0x18] sm:$0xff] }
  0x59   :  { %v1816_v38 = vpack.c.bf16 %v866_v37, %v865_v36  ;;  %v869_v42 = vld [vmem:[#allocation10 + $0x30] sm:$0xff]  ;;  %v870_v43 = vld [vmem:[#allocation10 + $0x38] sm:$0xff]  ;;  %v871_v45 = vld [vmem:[#allocation10 + $0x40] sm:$0xff] }
  0x5a   :  { %v1824_v44 = vpack.c.bf16 %v870_v43, %v869_v42  ;;  %v873_v48 = vld [vmem:[#allocation10 + $0x50] sm:$0xff]  ;;  %v874_v49 = vld [vmem:[#allocation10 + $0x58] sm:$0xff] }
  0x5b   :  { %1603 = vmatpush3.bf16.msra.mxu0 %v1600_v22  ;;  %1631 = vmatpush3.bf16.msra.mxu1 %v2152_v28 }
  0x5c   :  { %1605 = vmatprep.subr.bf16.mxu0 %v1604_v29  ;;  %1632 = vmatprep.subr.bf16.mxu1 %v2019_v0 }
  0x5f   :  { %1607 = vmatpush3.bf16.msra.mxu0 %v1604_v29  ;;  %1634 = vmatpush3.bf16.msra.mxu1 %v2156_v34 }
  0x60   :  { %1609 = vmatprep.subr.bf16.mxu0 %v1608_v35  ;;  %1635 = vmatprep.subr.bf16.mxu1 %v2019_v0 }
  0x63   :  { %1611 = vmatpush3.bf16.msra.mxu0 %v1608_v35  ;;  %1637 = vmatpush3.bf16.msra.mxu1 %v2160_v40 }
  0x64   :  { %1613 = vmatprep.subr.bf16.mxu0 %v1612_v41  ;;  %1638 = vmatprep.subr.bf16.mxu1 %v2019_v0 }
  0x67   :  { %1615 = vmatpush3.bf16.msra.mxu0 %v1612_v41  ;;  %1640 = vmatpush3.bf16.msra.mxu1 %v2164_v46  ;;  %v868_v41 = vld [vmem:[#allocation10 + $0x28] sm:$0xff] }
  0x68   :  { %1617 = vmatprep.subr.bf16.mxu0 %v1616_v47  ;;  %1641 = vmatprep.subr.bf16.mxu1 %v2019_v0 }
  0x6b   :  { %1619 = vmatpush3.bf16.msra.mxu0 %v1616_v47  ;;  %1643 = vmatpush3.bf16.msra.mxu1 %v2168_v50 }
  0x6c   :  { %1644 = vmatprep.subr.bf16.mxu0 %v2019_v0  ;;  %1668 = vmatprep.subr.bf16.mxu1 %v2019_v0 }
  0x6e   :  { %1253 = vmatmul.mubr.f32.vlgmr.msra.gmra.mrb[0].mxu0 %v88_v51  ;;  %1297 = vmatmul.mubr.f32.vlgmr.msra.gmra.mrb[0].mxu1 %v2021_v1  ;;  %v875_v51 = vld [vmem:[#allocation10 + $0x60] sm:$0xff] }
  0x6f   :  { %1646 = vmatpush3.bf16.msra.mxu0 %v2141_v9  ;;  %1670 = vmatpush3.bf16.msra.mxu1 %v2141_v9 }
  0x70   :  { %1647 = vmatprep.subr.bf16.mxu0 %v2019_v0  ;;  %1671 = vmatprep.subr.bf16.mxu1 %v2019_v0 }
  0x71   :  { %1366 = vmatprep.mubr.msk.f32.mxu1 %vm2020_vm0, %v2021_v1  ;;  %1255 = vmatprep.mubr.f32.mxu0 %v89_v52  ;;  %v876_v52 = vld [vmem:[#allocation10 + $0x68] sm:$0xff] }
  0x72   :  { %1256 = vmatmul.mubr.f32.gmra.mrb[2].mxu0 %v90_v53  ;;  %v1836_v53 = vpack.c.bf16 %v876_v52, %v875_v51 }
  0x73   :  { %1649 = vmatpush3.bf16.msra.mxu0 %v2144_v15  ;;  %1673 = vmatpush3.bf16.msra.mxu1 %v2144_v15 }
  0x74   :  { %1650 = vmatprep.subr.bf16.mxu0 %v2019_v0  ;;  %1674 = vmatprep.subr.bf16.mxu1 %v2019_v0 }
  0x75   :  { %1258 = vmatprep.mubr.f32.mxu0 %v91_v54  ;;  %v877_v54 = vld [vmem:[#allocation10 + $0x70] sm:$0xff] }
  0x76   :  { %1259 = vmatmul.mubr.f32.gmra.mrb[4].mxu0 %v92_v55  ;;  %v878_v55 = vld [vmem:[#allocation10 + $0x78] sm:$0xff] }
  0x77   :  { %1652 = vmatpush3.bf16.msra.mxu0 %v2148_v21  ;;  %1676 = vmatpush3.bf16.msra.mxu1 %v2148_v21 }
  0x78   :  { %1653 = vmatprep.subr.bf16.mxu0 %v2019_v0  ;;  %1677 = vmatprep.subr.bf16.mxu1 %v2019_v0 }
  0x79   :  { %1261 = vmatprep.mubr.f32.mxu0 %v93_v56  ;;  %v1840_v56 = vpack.c.bf16 %v878_v55, %v877_v54 }
  0x7a   :  { %1262 = vmatmul.mubr.f32.gmra.mrb[6].mxu0 %v94_v57 }
  0x7b   :  { %1655 = vmatpush3.bf16.msra.mxu0 %v2152_v28  ;;  %1679 = vmatpush3.bf16.msra.mxu1 %v2152_v28 }
  0x7c   :  { %1656 = vmatprep.subr.bf16.mxu0 %v2019_v0  ;;  %1680 = vmatprep.subr.bf16.mxu1 %v2019_v0 }
  0x7d   :  { %1331 = vmatprep.mubr.msk.f32.mxu0 %vm2020_vm0, %v2021_v1 }
  0x7f   :  { %1658 = vmatpush3.bf16.msra.mxu0 %v2156_v34  ;;  %1682 = vmatpush3.bf16.msra.mxu1 %v2156_v34 }
  0x80   :  { %1659 = vmatprep.subr.bf16.mxu0 %v2019_v0  ;;  %1683 = vmatprep.subr.bf16.mxu1 %v2019_v0 }
  0x83   :  { %1661 = vmatpush3.bf16.msra.mxu0 %v2160_v40  ;;  %1685 = vmatpush3.bf16.msra.mxu1 %v2160_v40 }
  0x84   :  { %1662 = vmatprep.subr.bf16.mxu0 %v2019_v0  ;;  %1686 = vmatprep.subr.bf16.mxu1 %v2019_v0 }
  0x87   :  { %1664 = vmatpush3.bf16.msra.mxu0 %v2164_v46  ;;  %1688 = vmatpush3.bf16.msra.mxu1 %v2164_v46 }
  0x88   :  { %1665 = vmatprep.subr.bf16.mxu0 %v2019_v0  ;;  %1689 = vmatprep.subr.bf16.mxu1 %v2019_v0 }
  0x8b   :  { %1667 = vmatpush3.bf16.msra.mxu0 %v2168_v50  ;;  %1691 = vmatpush3.bf16.msra.mxu1 %v2168_v50 }
  0x8c   :  { %1692 = vmatprep.subr.bf16.mxu0 %v2019_v0  ;;  %1716 = vmatprep.subr.bf16.mxu1 %v2019_v0 }
 0x141   :  { %v1254_v59 = vpop.f32.mrb[0].mxu0  ;;  %v315_v60 = vpop.f32.mrb[0].mxu1 }
 0x142   :  { %v184_v61 = vpop.f32.mrb[1].mxu0  ;;  %v1298_v62 = vpop.f32.mrb[1].mxu1  ;;  %v190_v11 = vadd.f32 %v1254_v59, %v2214_v58 }
 0x143   :  { %v185_v63 = vadd.f32 %v2214_v58, %v184_v61 }
 0x145   :  { %v319_v2 = vadd.f32 %v315_v60, %v185_v63  ;;  %v1257_v4 = vpop.f32.mrb[2].mxu0  ;;  %v1035_v63 = vld [vmem:[%s2387_s5] ss:$0 sm:$0xff]  ;;  %s2022_s5 = smov [#allocation13]  }
 0x146   :  { %v194_v5 = vpop.f32.mrb[3].mxu0  ;;  %v200_v23 = vadd.f32 %v1257_v4, %v2214_v58  ;;  %s1016_s29 = sshll.u32 %s2022_s5, 4  ;;  %s1017_s29 = int_to_ptr.vmem [resolvable:$true] %s1016_s29 }
 0x147   :  { %1855 = vtanh.f32 %v319_v2  ;;  %v195_v17 = vadd.f32 %v2214_v58, %v194_v5  ;;  %s1959_s30 = scalar_lea.vmem %s1017_s29, 1024  ;;  %p1964_p5 = scmp.lt.s32.totalorder %s1017_s29, %s1017_s29 }
 0x148   :  { %p1960_p4 = scmp.ne.s32.totalorder %s1017_s29, %s1959_s30  ;;  %p1965_p6 = scmp.lt.s32.totalorder %s1959_s30, %s1959_s30 }
 0x149   :  { %v2239_v6 = vpop.f32.mrb[4].mxu0 }
 0x14a   :  { %v2241_v7 = vpop.f32.mrb[5].mxu0  ;;  %p1966_p7 = por %p1965_p6, %p1964_p5 }
 0x14b   :  { %v205_v29 = vadd.f32 %v2214_v58, %v2241_v7 }
 0x14c   :  { %p1967_p8 = pnand %p1966_p7, %p1960_p4 }
 0x14d   :  { %v2243_v8 = vpop.f32.mrb[6].mxu0 }
 0x14e   :  { %v2245_v10 = vpop.f32.mrb[7].mxu0 }
 0x14f   :  { %v215_v57 = vadd.f32 %v2214_v58, %v2245_v10 }
 0x151   :  { %v2217_v3 = vpop.eup %1855 }
 0x152   :  { %321 = vst [vmem:[#allocation13] sm:$0xff] %v2217_v3  ;;  %1332 = vmatmul.mubr.f32.vlgmr.msra.gmra.mrb[8].mxu0 %v2217_v3 }
 0x153   :  { %1694 = vmatpush3.bf16.msra.mxu0 %v2141_v9  ;;  %1401 = vmatprep.mubr.msk.f32.mxu0 %vm2020_vm0, %v2021_v1 }
 0x154   :  { %1695 = vmatprep.subr.bf16.mxu0 %v2019_v0 }
 0x157   :  { %1697 = vmatpush3.bf16.msra.mxu0 %v2144_v15 }
 0x158   :  { %1698 = vmatprep.subr.bf16.mxu0 %v2019_v0 }
 0x15b   :  { %1700 = vmatpush3.bf16.msra.mxu0 %v2148_v21 }
 0x15c   :  { %1701 = vmatprep.subr.bf16.mxu0 %v2019_v0 }
 0x15f   :  { %1703 = vmatpush3.bf16.msra.mxu0 %v2152_v28 }
 0x160   :  { %1704 = vmatprep.subr.bf16.mxu0 %v2019_v0 }
 0x163   :  { %1706 = vmatpush3.bf16.msra.mxu0 %v2156_v34 }
 0x164   :  { %1707 = vmatprep.subr.bf16.mxu0 %v2019_v0 }
 0x167   :  { %1709 = vmatpush3.bf16.msra.mxu0 %v2160_v40 }
 0x168   :  { %1710 = vmatprep.subr.bf16.mxu0 %v2019_v0 }
 0x16b   :  { %1712 = vmatpush3.bf16.msra.mxu0 %v2164_v46 }
 0x16c   :  { %1713 = vmatprep.subr.bf16.mxu0 %v2019_v0 }
 0x16f   :  { %1715 = vmatpush3.bf16.msra.mxu0 %v2168_v50 }
 0x170   :  { %1740 = vmatprep.subr.bf16.mxu0 %v2019_v0 }
 0x225   :  { %v390_v12 = vpop.f32.mrb[8].mxu0 }
 0x226   :  { %v394_v13 = vadd.f32 %v390_v12, %v190_v11  ;;  %v1333_v14 = vpop.f32.mrb[9].mxu0 }
 0x228   :  { %1857 = vtanh.f32 %v394_v13 }
 0x232   :  { %v2248_v16 = vpop.eup %1857 }
 0x233   :  { %397 = vst [vmem:[#allocation13 + $0x8] sm:$0xff] %v2248_v16  ;;  %1367 = vmatmul.mubr.f32.vlgmr.msra.gmra.mrb[2].mxu1 %v2248_v16 }
 0x234   :  { %1718 = vmatpush3.bf16.msra.mxu1 %v2141_v9  ;;  %1436 = vmatprep.mubr.msk.f32.mxu1 %vm2020_vm0, %v2021_v1 }
 0x235   :  { %1719 = vmatprep.subr.bf16.mxu1 %v2019_v0 }
 0x238   :  { %1721 = vmatpush3.bf16.msra.mxu1 %v2144_v15 }
 0x239   :  { %1722 = vmatprep.subr.bf16.mxu1 %v2019_v0 }
 0x23c   :  { %1724 = vmatpush3.bf16.msra.mxu1 %v2148_v21 }
 0x23d   :  { %1725 = vmatprep.subr.bf16.mxu1 %v2019_v0 }
 0x240   :  { %1727 = vmatpush3.bf16.msra.mxu1 %v2152_v28 }
 0x241   :  { %1728 = vmatprep.subr.bf16.mxu1 %v2019_v0 }
 0x244   :  { %1730 = vmatpush3.bf16.msra.mxu1 %v2156_v34 }
 0x245   :  { %1731 = vmatprep.subr.bf16.mxu1 %v2019_v0 }
 0x248   :  { %1733 = vmatpush3.bf16.msra.mxu1 %v2160_v40 }
 0x249   :  { %1734 = vmatprep.subr.bf16.mxu1 %v2019_v0 }
 0x24c   :  { %1736 = vmatpush3.bf16.msra.mxu1 %v2164_v46 }
 0x24d   :  { %1737 = vmatprep.subr.bf16.mxu1 %v2019_v0 }
 0x250   :  { %1739 = vmatpush3.bf16.msra.mxu1 %v2168_v50 }
 0x251   :  { %1764 = vmatprep.subr.bf16.mxu1 %v2019_v0 }
 0x306   :  { %v466_v18 = vpop.f32.mrb[2].mxu1 }
 0x307   :  { %v470_v19 = vadd.f32 %v466_v18, %v195_v17  ;;  %v1368_v20 = vpop.f32.mrb[3].mxu1  ;;  %v220_v17 = vadd.f32 %v2243_v8, %v2214_v58 }
 0x309   :  { %1859 = vtanh.f32 %v470_v19 }
 0x313   :  { %v2271_v22 = vpop.eup %1859 }
 0x314   :  { %473 = vst [vmem:[#allocation13 + $0x10] sm:$0xff] %v2271_v22  ;;  %1402 = vmatmul.mubr.f32.vlgmr.msra.gmra.mrb[10].mxu0 %v2271_v22 }
 0x315   :  { %1742 = vmatpush3.bf16.msra.mxu0 %v2141_v9  ;;  %1471 = vmatprep.mubr.msk.f32.mxu0 %vm2020_vm0, %v2021_v1 }
 0x316   :  { %1743 = vmatprep.subr.bf16.mxu0 %v2019_v0 }
 0x319   :  { %1745 = vmatpush3.bf16.msra.mxu0 %v2144_v15 }
 0x31a   :  { %1746 = vmatprep.subr.bf16.mxu0 %v2019_v0 }
 0x31d   :  { %1748 = vmatpush3.bf16.msra.mxu0 %v2148_v21 }
 0x31e   :  { %1749 = vmatprep.subr.bf16.mxu0 %v2019_v0 }
 0x321   :  { %1751 = vmatpush3.bf16.msra.mxu0 %v2152_v28 }
 0x322   :  { %1752 = vmatprep.subr.bf16.mxu0 %v2019_v0 }
 0x325   :  { %1754 = vmatpush3.bf16.msra.mxu0 %v2156_v34 }
 0x326   :  { %1755 = vmatprep.subr.bf16.mxu0 %v2019_v0 }
 0x329   :  { %1757 = vmatpush3.bf16.msra.mxu0 %v2160_v40 }
 0x32a   :  { %1758 = vmatprep.subr.bf16.mxu0 %v2019_v0 }
 0x32d   :  { %1760 = vmatpush3.bf16.msra.mxu0 %v2164_v46 }
 0x32e   :  { %1761 = vmatprep.subr.bf16.mxu0 %v2019_v0 }
 0x331   :  { %1763 = vmatpush3.bf16.msra.mxu0 %v2168_v50 }
 0x332   :  { %1788 = vmatprep.subr.bf16.mxu0 %v2019_v0 }
 0x3e7   :  { %v542_v24 = vpop.f32.mrb[10].mxu0 }
 0x3e8   :  { %v546_v25 = vadd.f32 %v542_v24, %v200_v23  ;;  %v1403_v26 = vpop.f32.mrb[11].mxu0 }
 0x3ea   :  { %1861 = vtanh.f32 %v546_v25 }
 0x3f4   :  { %v2294_v27 = vpop.eup %1861 }
 0x3f5   :  { %549 = vst [vmem:[#allocation13 + $0x18] sm:$0xff] %v2294_v27  ;;  %1437 = vmatmul.mubr.f32.vlgmr.msra.gmra.mrb[4].mxu1 %v2294_v27 }
 0x3f6   :  { %1766 = vmatpush3.bf16.msra.mxu1 %v2141_v9  ;;  %1506 = vmatprep.mubr.msk.f32.mxu1 %vm2020_vm0, %v2021_v1 }
 0x3f7   :  { %1767 = vmatprep.subr.bf16.mxu1 %v2019_v0 }
 0x3fa   :  { %1769 = vmatpush3.bf16.msra.mxu1 %v2144_v15 }
 0x3fb   :  { %1770 = vmatprep.subr.bf16.mxu1 %v2019_v0 }
 0x3fe   :  { %1772 = vmatpush3.bf16.msra.mxu1 %v2148_v21 }
 0x3ff   :  { %1773 = vmatprep.subr.bf16.mxu1 %v2019_v0 }
 0x402   :  { %1775 = vmatpush3.bf16.msra.mxu1 %v2152_v28 }
 0x403   :  { %1776 = vmatprep.subr.bf16.mxu1 %v2019_v0 }
 0x406   :  { %1778 = vmatpush3.bf16.msra.mxu1 %v2156_v34 }
 0x407   :  { %1779 = vmatprep.subr.bf16.mxu1 %v2019_v0 }
 0x40a   :  { %1781 = vmatpush3.bf16.msra.mxu1 %v2160_v40 }
 0x40b   :  { %1782 = vmatprep.subr.bf16.mxu1 %v2019_v0 }
 0x40e   :  { %1784 = vmatpush3.bf16.msra.mxu1 %v2164_v46 }
 0x40f   :  { %1785 = vmatprep.subr.bf16.mxu1 %v2019_v0 }
 0x412   :  { %1787 = vmatpush3.bf16.msra.mxu1 %v2168_v50 }
 0x4c8   :  { %v618_v30 = vpop.f32.mrb[4].mxu1 }
 0x4c9   :  { %v622_v31 = vadd.f32 %v618_v30, %v205_v29  ;;  %v1438_v32 = vpop.f32.mrb[5].mxu1 }
 0x4cb   :  { %1863 = vtanh.f32 %v622_v31 }
 0x4d5   :  { %v2317_v33 = vpop.eup %1863 }
 0x4d6   :  { %625 = vst [vmem:[#allocation13 + $0x20] sm:$0xff] %v2317_v33  ;;  %1472 = vmatmul.mubr.f32.vlgmr.msra.gmra.mrb[12].mxu0 %v2317_v33 }
 0x4d7   :  { %1790 = vmatpush3.bf16.msra.mxu0 %v2141_v9  ;;  %1541 = vmatprep.mubr.msk.f32.mxu0 %vm2020_vm0, %v2021_v1  ;;  %v863_v1 = vld [vmem:[#allocation10] sm:$0xff]  ;;  %v864_v9 = vld [vmem:[#allocation10 + $0x8] sm:$0xff] }
 0x4d8   :  { %1791 = vmatprep.subr.bf16.mxu0 %v2019_v0 }
 0x4db   :  { %1793 = vmatpush3.bf16.msra.mxu0 %v2144_v15  ;;  %v1812_v15 = vpack.c.bf16 %v864_v9, %v863_v1 }
 0x4dc   :  { %1794 = vmatprep.subr.bf16.mxu0 %v2019_v0 }
 0x4dd   :  { %1813 = vmatprep.subr.bf16.mxu1 %v1812_v15 }
 0x4df   :  { %1796 = vmatpush3.bf16.msra.mxu0 %v2148_v21  ;;  %v210_v21 = vadd.f32 %v2239_v6, %v2214_v58 }
 0x4e0   :  { %1797 = vmatprep.subr.bf16.mxu0 %v2019_v0 }
 0x4e3   :  { %1799 = vmatpush3.bf16.msra.mxu0 %v2152_v28 }
 0x4e4   :  { %1800 = vmatprep.subr.bf16.mxu0 %v2019_v0 }
 0x4e7   :  { %1802 = vmatpush3.bf16.msra.mxu0 %v2156_v34 }
 0x4e8   :  { %1803 = vmatprep.subr.bf16.mxu0 %v2019_v0 }
 0x4eb   :  { %1805 = vmatpush3.bf16.msra.mxu0 %v2160_v40  ;;  %v867_v40 = vld [vmem:[#allocation10 + $0x20] sm:$0xff] }
 0x4ec   :  { %1806 = vmatprep.subr.bf16.mxu0 %v2019_v0 }
 0x4ef   :  { %1808 = vmatpush3.bf16.msra.mxu0 %v2164_v46  ;;  %v872_v46 = vld [vmem:[#allocation10 + $0x48] sm:$0xff] }
 0x4f0   :  { %1809 = vmatprep.subr.bf16.mxu0 %v2019_v0  ;;  %v1820_v0 = vpack.c.bf16 %v868_v41, %v867_v40  ;;  %v1828_v47 = vpack.c.bf16 %v872_v46, %v871_v45 }
 0x4f3   :  { %1811 = vmatpush3.bf16.msra.mxu0 %v2168_v50  ;;  %v1832_v50 = vpack.c.bf16 %v874_v49, %v873_v48 }
 0x5a9   :  { %v694_v28 = vpop.f32.mrb[12].mxu0 }
 0x5aa   :  { %v698_v34 = vadd.f32 %v694_v28, %v210_v21  ;;  %v1473_v35 = vpop.f32.mrb[13].mxu0 }
 0x5ac   :  { %1865 = vtanh.f32 %v698_v34 }
 0x5b6   :  { %v1866_v39 = vpop.eup %1865 }
 0x5b7   :  { %701 = vst [vmem:[#allocation13 + $0x28] sm:$0xff] %v1866_v39  ;;  %1507 = vmatmul.mubr.f32.vlgmr.msra.gmra.mrb[6].mxu1 %v1866_v39 }
 0x5b8   :  { %1815 = vmatpush3.bf16.msra.mxu1 %v1812_v15  ;;  %1576 = vmatprep.mubr.f32.mxu1 %v2217_v3 }
 0x5b9   :  { %1817 = vmatprep.subr.bf16.mxu1 %v1816_v38 }
 0x5bc   :  { %1819 = vmatpush3.bf16.msra.mxu1 %v1816_v38 }
 0x5bd   :  { %1821 = vmatprep.subr.bf16.mxu1 %v1820_v0 }
 0x5c0   :  { %1823 = vmatpush3.bf16.msra.mxu1 %v1820_v0 }
 0x5c1   :  { %1825 = vmatprep.subr.bf16.mxu1 %v1824_v44 }
 0x5c4   :  { %1827 = vmatpush3.bf16.msra.mxu1 %v1824_v44 }
 0x5c5   :  { %1829 = vmatprep.subr.bf16.mxu1 %v1828_v47 }
 0x5c8   :  { %1831 = vmatpush3.bf16.msra.mxu1 %v1828_v47 }
 0x5c9   :  { %1833 = vmatprep.subr.bf16.mxu1 %v1832_v50 }
 0x5cc   :  { %1835 = vmatpush3.bf16.msra.mxu1 %v1832_v50 }
 0x5cd   :  { %1837 = vmatprep.subr.bf16.mxu1 %v1836_v53 }
 0x5d0   :  { %1839 = vmatpush3.bf16.msra.mxu1 %v1836_v53 }
 0x5d1   :  { %1841 = vmatprep.subr.bf16.mxu1 %v1840_v56 }
 0x5d4   :  { %1843 = vmatpush3.bf16.msra.mxu1 %v1840_v56 }
 0x5d7   :  { %1577 = vmatmul.mubr.f32.vlgmr.msra.gmra.mrb[8].mxu1 %v2248_v16 }
 0x5d8   :  { %1579 = vmatprep.mubr.f32.mxu1 %v2271_v22 }
 0x5db   :  { %1580 = vmatmul.mubr.f32.gmra.mrb[10].mxu1 %v2294_v27 }
 0x5dc   :  { %1582 = vmatprep.mubr.f32.mxu1 %v2317_v33 }
 0x5df   :  { %1583 = vmatmul.mubr.f32.gmra.mrb[12].mxu1 %v1866_v39 }
 0x68a   :  { %v770_v59 = vpop.f32.mrb[6].mxu1 }
 0x68b   :  { %v774_v60 = vadd.f32 %v770_v59, %v215_v57  ;;  %v1508_v61 = vpop.f32.mrb[7].mxu1 }
 0x68d   :  { %1867 = vtanh.f32 %v774_v60 }
 0x697   :  { %v1868_v62 = vpop.eup %1867 }
 0x698   :  { %777 = vst [vmem:[#allocation13 + $0x30] sm:$0xff] %v1868_v62  ;;  %1542 = vmatmul.mubr.f32.vlgmr.msra.gmra.mrb[14].mxu0 %v1868_v62  ;;  %1585 = vmatprep.mubr.f32.mxu1 %v1868_v62 }
 0x6aa   :  { %v1578_v2 = vpop.f32.mrb[8].mxu1 }
 0x6ab   :  { %v958_v3 = vadd.f32 %v1578_v2, %v1035_v63  ;;  %v952_v4 = vpop.f32.mrb[9].mxu1 }
 0x6ac   :  { %v953_v5 = vadd.f32 %v1035_v63, %v952_v4 }
 0x6ad   :  { %992 = vst [vmem:[#allocation12 + $0x8] sm:$0xff] %v958_v3 }
 0x6ae   :  { %991 = vst [vmem:[#allocation12] sm:$0xff] %v953_v5  ;;  %v1581_v6 = vpop.f32.mrb[10].mxu1 }
 0x6af   :  { %v968_v7 = vadd.f32 %v1581_v6, %v1035_v63  ;;  %v962_v10 = vpop.f32.mrb[11].mxu1 }
 0x6b0   :  { %v963_v11 = vadd.f32 %v1035_v63, %v962_v10 }
 0x6b1   :  { %994 = vst [vmem:[#allocation12 + $0x18] sm:$0xff] %v968_v7 }
 0x6b2   :  { %993 = vst [vmem:[#allocation12 + $0x10] sm:$0xff] %v963_v11  ;;  %v1584_v12 = vpop.f32.mrb[12].mxu1 }
 0x6b3   :  { %v978_v13 = vadd.f32 %v1584_v12, %v1035_v63  ;;  %v972_v14 = vpop.f32.mrb[13].mxu1 }
 0x6b4   :  { %v973_v16 = vadd.f32 %v1035_v63, %v972_v14 }
 0x6b5   :  { %996 = vst [vmem:[#allocation12 + $0x28] sm:$0xff] %v978_v13 }
 0x6b6   :  { %995 = vst [vmem:[#allocation12 + $0x20] sm:$0xff] %v973_v16 }
 0x76b   :  { %v846_v18 = vpop.f32.mrb[14].mxu0 }
 0x76c   :  { %v850_v19 = vadd.f32 %v846_v18, %v220_v17  ;;  %v1543_v20 = vpop.f32.mrb[15].mxu0 }
 0x76e   :  { %1869 = vtanh.f32 %v850_v19 }
 0x778   :  { %v1870_v22 = vpop.eup %1869 }
 0x779   :  { %853 = vst [vmem:[#allocation13 + $0x38] sm:$0xff] %v1870_v22  ;;  %1586 = vmatmul.mubr.f32.gmra.mrb[14].mxu1 %v1870_v22 }
 0x77a   :  { %1970 = shalt.err (!%p1967_p8)
}
 0x77b   :  { %s1971_s10 = scalar_lea.hbm %s2389_s7, 1024 }
 0x77c   :  { %p1972_p9 = scmp.ne.s32.totalorder %s2389_s7, %s1971_s10  ;;  %p1975_p10 = scmp.lt.u32.totalorder %s1971_s10, %s2389_s7 }
 0x77e   :  { %p1977_p11 = pnand %p1975_p10, %p1972_p9 }
 0x780   :  { %1980 = shalt.err (!%p1977_p11)
}
 0x781   :  { %1022 = dma.vmem_to_hbm [thread:$0]  %s1017_s29, 1024, %s2389_s7, [#allocation14], %s2015_s13, %s2015_s13, %s2016_s14  }
 0x782   :  { %s2023_s17 = smov [#allocation12]  }
 0x783   :  { %s1004_s18 = sshll.u32 %s2023_s17, 4  ;;  %s1005_s18 = int_to_ptr.vmem [resolvable:$true] %s1004_s18 }
 0x784   :  { %s1981_s19 = scalar_lea.vmem %s1005_s18, 1024  ;;  %p1986_p13 = scmp.lt.s32.totalorder %s1005_s18, %s1005_s18 }
 0x785   :  { %p1982_p12 = scmp.ne.s32.totalorder %s1005_s18, %s1981_s19  ;;  %p1987_p0 = scmp.lt.s32.totalorder %s1981_s19, %s1981_s19 }
 0x787   :  { %p1988_p1 = por %p1987_p0, %p1986_p13 }
 0x789   :  { %p1989_p2 = pnand %p1988_p1, %p1982_p12 }
 0x84c   :  { %v1587_v58 = vpop.f32.mrb[14].mxu1 }
 0x84d   :  { %v988_v8 = vadd.f32 %v1587_v58, %v1035_v63  ;;  %v982_v23 = vpop.f32.mrb[15].mxu1 }
 0x84e   :  { %v983_v24 = vadd.f32 %v1035_v63, %v982_v23 }
 0x84f   :  { %998 = vst [vmem:[#allocation12 + $0x38] sm:$0xff] %v988_v8 }
 0x850   :  { %997 = vst [vmem:[#allocation12 + $0x30] sm:$0xff] %v983_v24 }
 0x851   :  { %1992 = shalt.err (!%p1989_p2)
}
 0x852   :  { %s1993_s7 = scalar_lea.hbm %s2388_s6, 1024 }
 0x853   :  { %p1994_p3 = scmp.ne.s32.totalorder %s2388_s6, %s1993_s7  ;;  %p1997_p4 = scmp.lt.u32.totalorder %s1993_s7, %s2388_s6 }
 0x855   :  { %p1999_p5 = pnand %p1997_p4, %p1994_p3 }
 0x857   :  { %2002 = shalt.err (!%p1999_p5)
}
 0x858   :  { %1010 = dma.vmem_to_hbm [thread:$0]  %s1005_s18, 1024, %s2388_s6, [#allocation6], %s2015_s13, %s2015_s13, %s2016_s14  }
 0x859   :  { %2009 = dma.done.wait [#allocation6], 1024  }
 0x85a   :  { %2010 = vsyncadd [#allocation6], 4294966272 }
 0x85b   :  { %2011 = dma.done.wait [#allocation14], 1024  }
 0x85c   :  { %2012 = vsyncadd [#allocation14], 4294966272 }
 0x85d   :  { %1029 = vsyncpa [#allocation5], 1 }
 0x85e   :  { %1030 = vsyncpa [#allocation8], 1 }
 0x85f   :  { %1031 = vsyncpa [#allocation11], 1 }
 0x860   :  { %1032 = vsyncpa [#allocation6], 1 }
 0x861   :  { %1033 = vsyncpa [#allocation14], 1 }

</bundles_post_ra>
